<compile_context>
chip_gen: v7x
topology: tpu7x:2x2x1
jax: 0.10.0
libtpu: 0.0.40
codegen_flags: <defaults>
</compile_context>

<pallas_src>
import functools

import jax
import jax.numpy as jnp
from jax import lax
from jax.experimental import pallas as pl
from jax.experimental.pallas import tpu as pltpu

_BN_EPS = 1e-5
_LANE = 128


def _round_up(v, mult):
    return (v + mult - 1) // mult * mult


def _down_resblock_kernel(x_ref, mask_ref, g1_ref, d1_ref, w1_ref,
                          g2_ref, d2_ref, w2_ref, wsc_ref, bo_ref,
                          o_ref, *, w_pad, margin, l1):
    """Fused pre-activation ResBlock on one pooled, zero-framed image.

    x_ref : (1, C_in_p, L2)    pooled input: zero ring + flatten + zero margins
    mask  : (1, L2)            1.0 at real (interior) image pixels of the frame
    o_ref : (1, C_out_p, L_out) output on the padded-flat frame (lane-dense)
    """
    m = margin
    l_out = o_ref.shape[2]
    # Flat-coordinate offsets of the 9 taps of a 3x3 conv (pad=1), row-major.
    offs = [(u - 1) * w_pad + (v - 1) for u in range(3) for v in range(3)]

    x = x_ref[0]                               # (C_in_p, L2), f32
    mask = mask_ref[...]                       # (1, L2)

    # Shortcut branch: 1x1 conv of the pooled input (its bias folded into bo).
    sc = jnp.dot(wsc_ref[...], x[:, 2 * m: 2 * m + l_out],
                 preferred_element_type=jnp.float32)

    # Main branch: BN1 -> ReLU; re-zero the padding ring / margins with the mask.
    t = jnp.maximum(x * g1_ref[...] + d1_ref[...], 0.0) * mask

    # conv1: im2col-pack the 9 shifted taps along the sublane axis and issue a
    # single (C_out_p, 9*C_in_p) x (9*C_in_p, L1) MXU matmul.
    s1 = jnp.concatenate([t[:, m + off: m + off + l1] for off in offs], axis=0)
    h = jnp.dot(w1_ref[...], s1, preferred_element_type=jnp.float32)

    # BN2 (conv1 bias pre-folded into the shift) -> ReLU -> re-zero the ring.
    # The conv1-frame mask is just a shifted slice of the input-frame mask.
    h = jnp.maximum(h * g2_ref[...] + d2_ref[...], 0.0) * mask[:, m: m + l1]

    # conv2: single im2col matmul.
    s2 = jnp.concatenate([h[:, m + off: m + off + l_out] for off in offs], axis=0)
    y = jnp.dot(w2_ref[...], s2, preferred_element_type=jnp.float32)

    # Residual add + folded (conv2 + shortcut) bias, single lane-dense store.
    o_ref[0] = (y + sc + bo_ref[...]).astype(o_ref.dtype)


def down_forward(x, params):
    """Forward pass of Down (MaxPool2d(2,2) then pre-activation residual block).

    x: (N, C_in, H, W) float32 with H, W even.  Returns (N, C_out, H//2, W//2).
    """
    n, c_in, h, w = x.shape
    assert h % 2 == 0 and w % 2 == 0, "H and W must be even for 2x2 pooling"
    c_out = params["conv1_w"].shape[0]
    c_in_p = _round_up(c_in, 8)
    c_out_p = _round_up(c_out, 8)

    hp, wp = h // 2, w // 2
    h_pad, w_pad = hp + 2, wp + 2
    sp = h_pad * w_pad                     # zero-ringed, flattened spatial length
    m = w_pad + 1                          # largest |3x3 tap offset| in flat coords
    l_out = _round_up(sp, _LANE)           # conv2-output / shortcut frame (lane-dense)
    l1 = _round_up(l_out + 2 * m, _LANE)   # conv1-output frame
    l2 = _round_up(l1 + 2 * m, _LANE)      # pooled-input frame (kernel input)

    # --- MaxPool 2x2 + zero ring + channel pad + flatten + margins (XLA pre-pass) ---
    # TODO(synk): the 2x2 max window reduction itself stays in XLA (lane-strided
    # 2x2 gather has no clean Mosaic lowering); under jax.jit this whole chain
    # fuses into one pre-pass.  Everything after the pool is fused in Pallas.
    pooled = jnp.max(x.reshape(n, c_in, hp, 2, wp, 2), axis=(3, 5))
    xp = jnp.pad(pooled, ((0, 0), (0, c_in_p - c_in), (1, 1), (1, 1)))
    x_ext = jnp.pad(xp.reshape(n, c_in_p, sp),
                    ((0, 0), (0, 0), (2 * m, l2 - sp - 2 * m)))          # (n,c_in_p,l2)

    interior = jnp.pad(jnp.ones((hp, wp), jnp.float32),
                       ((1, 1), (1, 1))).reshape(sp)
    mask = jnp.pad(interior, (2 * m, l2 - sp - 2 * m)).reshape(1, l2)

    # --- Fold BatchNorm (inference mode) + biases into per-channel scale/shift. ---
    # TODO(synk): training-mode BatchNorm (batch statistics) would need a
    # cross-batch reduction pass; inference-mode running stats are folded here.
    g1 = params["bn1_gamma"] / jnp.sqrt(params["bn1_var"] + _BN_EPS)
    d1 = params["bn1_beta"] - params["bn1_mean"] * g1
    g2 = params["bn2_gamma"] / jnp.sqrt(params["bn2_var"] + _BN_EPS)
    d2 = params["bn2_beta"] - params["bn2_mean"] * g2 + params["conv1_b"] * g2
    b_out = params["conv2_b"] + params["sc_b"]

    def col(v, cp):
        return jnp.pad(v, (0, cp - v.shape[0])).reshape(cp, 1).astype(jnp.float32)

    def pack3x3(wgt, ci_p):
        # (C_out, C_in, 3, 3) -> (C_out_p, 9*C_in_p); column k*C_in_p + c holds
        # w[:, c, u, v] with k = u*3 + v, matching the in-kernel concat order.
        co, ci = wgt.shape[:2]
        wpad = jnp.pad(wgt, ((0, c_out_p - co), (0, ci_p - ci), (0, 0), (0, 0)))
        return wpad.transpose(0, 2, 3, 1).reshape(c_out_p, 9 * ci_p).astype(jnp.float32)

    w1_packed = pack3x3(params["conv1_w"], c_in_p)
    w2_packed = pack3x3(params["conv2_w"], c_out_p)
    w_sc = jnp.pad(params["sc_w"].reshape(c_out, c_in),
                   ((0, c_out_p - c_out), (0, c_in_p - c_in))).astype(jnp.float32)

    def resident(shape):
        return pl.BlockSpec(shape, lambda i: (0,) * len(shape))

    kernel = functools.partial(_down_resblock_kernel, w_pad=w_pad, margin=m, l1=l1)

    flops = 2 * n * (9 * c_in_p * c_out_p * l1
                     + 9 * c_out_p * c_out_p * l_out
                     + c_in_p * c_out_p * l_out)
    bytes_accessed = 4 * (n * c_in_p * l2 + n * c_out_p * l_out + l2
                          + 9 * c_in_p * c_out_p + 9 * c_out_p * c_out_p
                          + c_in_p * c_out_p + 2 * c_in_p + 3 * c_out_p)

    out_flat = pl.pallas_call(
        kernel,
        out_shape=jax.ShapeDtypeStruct((n, c_out_p, l_out), x.dtype),
        grid=(n,),
        in_specs=[
            pl.BlockSpec((1, c_in_p, l2), lambda i: (i, 0, 0)),   # pooled input
            resident((1, l2)),                                    # interior mask
            resident((c_in_p, 1)), resident((c_in_p, 1)),         # BN1 scale/shift
            resident((c_out_p, 9 * c_in_p)),                      # conv1 w (packed)
            resident((c_out_p, 1)), resident((c_out_p, 1)),       # BN2 scale/shift'
            resident((c_out_p, 9 * c_out_p)),                     # conv2 w (packed)
            resident((c_out_p, c_in_p)),                          # shortcut w
            resident((c_out_p, 1)),                               # folded out bias
        ],
        out_specs=pl.BlockSpec((1, c_out_p, l_out), lambda i: (i, 0, 0)),
        compiler_params=pltpu.CompilerParams(
            dimension_semantics=("parallel",),
            vmem_limit_bytes=32 * 1024 * 1024),
        cost_estimate=pl.CostEstimate(
            flops=flops, transcendentals=0, bytes_accessed=bytes_accessed),
    )(x_ext, mask, col(g1, c_in_p), col(d1, c_in_p), w1_packed,
      col(g2, c_out_p), col(d2, c_out_p), w2_packed, w_sc, col(b_out, c_out_p))

    # Crop lane padding, padded channels and the zero ring; restore NCHW.
    # (When the consumer is another fused block, return out_flat directly and
    #  crop only at the network boundary to skip this extra HBM pass.)
    out = out_flat[:, :c_out, :sp].reshape(n, c_out, h_pad, w_pad)
    return out[:, :, 1:-1, 1:-1]


def init_down_params(key, in_c, out_c, dtype=jnp.float32):
    """Deterministic parameters for Down(in_c, out_c, pool='max', conv='residual')."""
    ks = jax.random.split(key, 14)

    def uconv(k, shape, fan_in):
        bound = float(1.0 / (fan_in ** 0.5))
        return jax.random.uniform(k, shape, dtype, -bound, bound)

    return {
        # BatchNorm1 (in_c) -- inference-mode affine params / running stats.
        "bn1_gamma": jax.random.uniform(ks[0], (in_c,), dtype, 0.5, 1.5),
        "bn1_beta": 0.1 * jax.random.normal(ks[1], (in_c,), dtype),
        "bn1_mean": 0.1 * jax.random.normal(ks[2], (in_c,), dtype),
        "bn1_var": jax.random.uniform(ks[3], (in_c,), dtype, 0.5, 1.5),
        # Conv1: 3x3, in_c -> out_c.
        "conv1_w": uconv(ks[4], (out_c, in_c, 3, 3), in_c * 9),
        "conv1_b": uconv(ks[5], (out_c,), in_c * 9),
        # BatchNorm2 (out_c).
        "bn2_gamma": jax.random.uniform(ks[6], (out_c,), dtype, 0.5, 1.5),
        "bn2_beta": 0.1 * jax.random.normal(ks[7], (out_c,), dtype),
        "bn2_mean": 0.1 * jax.random.normal(ks[8], (out_c,), dtype),
        "bn2_var": jax.random.uniform(ks[9], (out_c,), dtype, 0.5, 1.5),
        # Conv2: 3x3, out_c -> out_c.
        "conv2_w": uconv(ks[10], (out_c, out_c, 3, 3), out_c * 9),
        "conv2_b": uconv(ks[11], (out_c,), out_c * 9),
        # Shortcut: 1x1, in_c -> out_c.
        "sc_w": uconv(ks[12], (out_c, in_c, 1, 1), in_c),
        "sc_b": uconv(ks[13], (out_c,), in_c),
    }


def down_reference(x, params):
    """Pure-JAX reference for Down (max pool 2x2 -> pre-activation ResBlock)."""
    n, c_in, h, w = x.shape
    pooled = jnp.max(x.reshape(n, c_in, h // 2, 2, w // 2, 2), axis=(3, 5))

    def bn(v, gamma, beta, mean, var):
        s = gamma / jnp.sqrt(var + _BN_EPS)
        return v * s[None, :, None, None] + (beta - mean * s)[None, :, None, None]

    def conv(v, wgt, bias):
        y = lax.conv_general_dilated(
            v, wgt, window_strides=(1, 1),
            padding="SAME" if wgt.shape[-1] == 3 else "VALID",
            dimension_numbers=("NCHW", "OIHW", "NCHW"),
            precision=lax.Precision.HIGHEST)
        return y + bias[None, :, None, None]

    t = jax.nn.relu(bn(pooled, params["bn1_gamma"], params["bn1_beta"],
                       params["bn1_mean"], params["bn1_var"]))
    t = conv(t, params["conv1_w"], params["conv1_b"])
    t = jax.nn.relu(bn(t, params["bn2_gamma"], params["bn2_beta"],
                       params["bn2_mean"], params["bn2_var"]))
    t = conv(t, params["conv2_w"], params["conv2_b"])
    shortcut = conv(pooled, params["sc_w"], params["sc_b"])
    return t + shortcut


if __name__ == "__main__":
    key = jax.random.PRNGKey(0)
    k_x, k_p = jax.random.split(key)

    N, C_IN, H, W = 2, 4, 16, 16
    C_OUT = 8

    x = jax.random.normal(k_x, (N, C_IN, H, W), dtype=jnp.float32)
    params = init_down_params(k_p, C_IN, C_OUT)

    fwd = jax.jit(down_forward)
    y = fwd(x, params)
    jax.block_until_ready(y)

    y_ref = down_reference(x, params)
    assert y.shape == (N, C_OUT, H // 2, W // 2), y.shape
    max_err = float(jnp.max(jnp.abs(y - y_ref)))
    # Kernel matmuls run at default MXU precision (single bf16 pass, f32 acc);
    # the reference is full-f32 HIGHEST, so allow a bf16-level tolerance.
    assert jnp.allclose(y, y_ref, atol=1e-2, rtol=1e-2), f"max abs err {max_err}"

    print("KERNEL_OK")
</pallas_src>

<mosaic_0001>
module attributes {stable_mosaic.version = 11 : i64} {
  func.func @_down_resblock_kernel(%arg0: i32, %arg1: memref<1x8x384xf32, #tpu.memory_space<vmem>>, %arg2: memref<1x384xf32, #tpu.memory_space<vmem>>, %arg3: memref<8x1xf32, #tpu.memory_space<vmem>>, %arg4: memref<8x1xf32, #tpu.memory_space<vmem>>, %arg5: memref<8x72xf32, #tpu.memory_space<vmem>>, %arg6: memref<8x1xf32, #tpu.memory_space<vmem>>, %arg7: memref<8x1xf32, #tpu.memory_space<vmem>>, %arg8: memref<8x72xf32, #tpu.memory_space<vmem>>, %arg9: memref<8x8xf32, #tpu.memory_space<vmem>>, %arg10: memref<8x1xf32, #tpu.memory_space<vmem>>, %arg11: memref<1x8x128xf32, #tpu.memory_space<vmem>>) attributes {dimension_semantics = [#tpu.dimension_semantics<parallel>], iteration_bounds = array<i64: 2>, scalar_prefetch = 0 : i64, scratch_operands = 0 : i64, tpu.core_type = #tpu.core_type<tc>, window_params = [{transform_indices = @transform_0, window_bounds = array<i64: 1, 8, 384>}, {pipeline_mode = #tpu.pipeline_mode<synchronous>, transform_indices = @transform_1, window_bounds = array<i64: 1, 384>}, {pipeline_mode = #tpu.pipeline_mode<synchronous>, transform_indices = @transform_2, window_bounds = array<i64: 8, 1>}, {pipeline_mode = #tpu.pipeline_mode<synchronous>, transform_indices = @transform_3, window_bounds = array<i64: 8, 1>}, {pipeline_mode = #tpu.pipeline_mode<synchronous>, transform_indices = @transform_4, window_bounds = array<i64: 8, 72>}, {pipeline_mode = #tpu.pipeline_mode<synchronous>, transform_indices = @transform_5, window_bounds = array<i64: 8, 1>}, {pipeline_mode = #tpu.pipeline_mode<synchronous>, transform_indices = @transform_6, window_bounds = array<i64: 8, 1>}, {pipeline_mode = #tpu.pipeline_mode<synchronous>, transform_indices = @transform_7, window_bounds = array<i64: 8, 72>}, {pipeline_mode = #tpu.pipeline_mode<synchronous>, transform_indices = @transform_8, window_bounds = array<i64: 8, 8>}, {pipeline_mode = #tpu.pipeline_mode<synchronous>, transform_indices = @transform_9, window_bounds = array<i64: 8, 1>}, {transform_indices = @transform_10, window_bounds = array<i64: 1, 8, 128>}]} {
    %c0 = arith.constant 0 : index
    %c0_0 = arith.constant 0 : index
    %c0_1 = arith.constant 0 : index
    %0 = vector.load %arg1[%c0, %c0_0, %c0_1] : memref<1x8x384xf32, #tpu.memory_space<vmem>>, vector<1x8x384xf32>
    %1 = vector.shape_cast %0 : vector<1x8x384xf32> to vector<8x384xf32>
    %c0_2 = arith.constant 0 : index
    %c0_3 = arith.constant 0 : index
    %2 = vector.load %arg2[%c0_2, %c0_3] : memref<1x384xf32, #tpu.memory_space<vmem>>, vector<1x384xf32>
    %c0_4 = arith.constant 0 : index
    %c0_5 = arith.constant 0 : index
    %3 = vector.load %arg9[%c0_4, %c0_5] : memref<8x8xf32, #tpu.memory_space<vmem>>, vector<8x8xf32>
    %4 = vector.extract_strided_slice %1 {offsets = [0, 22], sizes = [8, 128], strides = [1, 1]} : vector<8x384xf32> to vector<8x128xf32>
    %cst = arith.constant dense<0.000000e+00> : vector<8x128xf32>
    %5 = tpu.matmul %3, %4, %cst {dimension_numbers = #tpu.dot_dimension_numbers<[1], [0], [0], [1], [0, 0, 1, 1], [], []>} : vector<8x8xf32>, vector<8x128xf32>, vector<8x128xf32> -> vector<8x128xf32>
    %c0_6 = arith.constant 0 : index
    %c0_7 = arith.constant 0 : index
    %6 = vector.load %arg3[%c0_6, %c0_7] : memref<8x1xf32, #tpu.memory_space<vmem>>, vector<8x1xf32>
    %7 = vector.broadcast %6 : vector<8x1xf32> to vector<8x384xf32>
    %8 = arith.mulf %1, %7 : vector<8x384xf32>
    %c0_8 = arith.constant 0 : index
    %c0_9 = arith.constant 0 : index
    %9 = vector.load %arg4[%c0_8, %c0_9] : memref<8x1xf32, #tpu.memory_space<vmem>>, vector<8x1xf32>
    %10 = vector.broadcast %9 : vector<8x1xf32> to vector<8x384xf32>
    %11 = arith.addf %8, %10 : vector<8x384xf32>
    %cst_10 = arith.constant 0.000000e+00 : f32
    %12 = vector.broadcast %cst_10 : f32 to vector<8x384xf32>
    %13 = arith.maximumf %11, %12 : vector<8x384xf32>
    %14 = vector.broadcast %2 : vector<1x384xf32> to vector<8x384xf32>
    %15 = arith.mulf %13, %14 : vector<8x384xf32>
    %16 = vector.extract_strided_slice %15 {offsets = [0, 0], sizes = [8, 256], strides = [1, 1]} : vector<8x384xf32> to vector<8x256xf32>
    %17 = vector.extract_strided_slice %15 {offsets = [0, 1], sizes = [8, 256], strides = [1, 1]} : vector<8x384xf32> to vector<8x256xf32>
    %18 = vector.extract_strided_slice %15 {offsets = [0, 2], sizes = [8, 256], strides = [1, 1]} : vector<8x384xf32> to vector<8x256xf32>
    %19 = vector.extract_strided_slice %15 {offsets = [0, 10], sizes = [8, 256], strides = [1, 1]} : vector<8x384xf32> to vector<8x256xf32>
    %20 = vector.extract_strided_slice %15 {offsets = [0, 11], sizes = [8, 256], strides = [1, 1]} : vector<8x384xf32> to vector<8x256xf32>
    %21 = vector.extract_strided_slice %15 {offsets = [0, 12], sizes = [8, 256], strides = [1, 1]} : vector<8x384xf32> to vector<8x256xf32>
    %22 = vector.extract_strided_slice %15 {offsets = [0, 20], sizes = [8, 256], strides = [1, 1]} : vector<8x384xf32> to vector<8x256xf32>
    %23 = vector.extract_strided_slice %15 {offsets = [0, 21], sizes = [8, 256], strides = [1, 1]} : vector<8x384xf32> to vector<8x256xf32>
    %24 = vector.extract_strided_slice %15 {offsets = [0, 22], sizes = [8, 256], strides = [1, 1]} : vector<8x384xf32> to vector<8x256xf32>
    %25 = tpu.concatenate %16, %17, %18, %19, %20, %21, %22, %23, %24 in 0 : vector<8x256xf32>, vector<8x256xf32>, vector<8x256xf32>, vector<8x256xf32>, vector<8x256xf32>, vector<8x256xf32>, vector<8x256xf32>, vector<8x256xf32>, vector<8x256xf32> -> vector<72x256xf32>
    %c0_11 = arith.constant 0 : index
    %c0_12 = arith.constant 0 : index
    %26 = vector.load %arg5[%c0_11, %c0_12] : memref<8x72xf32, #tpu.memory_space<vmem>>, vector<8x72xf32>
    %cst_13 = arith.constant dense<0.000000e+00> : vector<8x256xf32>
    %27 = tpu.matmul %26, %25, %cst_13 {dimension_numbers = #tpu.dot_dimension_numbers<[1], [0], [0], [1], [0, 0, 1, 1], [], []>} : vector<8x72xf32>, vector<72x256xf32>, vector<8x256xf32> -> vector<8x256xf32>
    %c0_14 = arith.constant 0 : index
    %c0_15 = arith.constant 0 : index
    %28 = vector.load %arg6[%c0_14, %c0_15] : memref<8x1xf32, #tpu.memory_space<vmem>>, vector<8x1xf32>
    %29 = vector.broadcast %28 : vector<8x1xf32> to vector<8x256xf32>
    %30 = arith.mulf %27, %29 : vector<8x256xf32>
    %c0_16 = arith.constant 0 : index
    %c0_17 = arith.constant 0 : index
    %31 = vector.load %arg7[%c0_16, %c0_17] : memref<8x1xf32, #tpu.memory_space<vmem>>, vector<8x1xf32>
    %32 = vector.broadcast %31 : vector<8x1xf32> to vector<8x256xf32>
    %33 = arith.addf %30, %32 : vector<8x256xf32>
    %cst_18 = arith.constant 0.000000e+00 : f32
    %34 = vector.broadcast %cst_18 : f32 to vector<8x256xf32>
    %35 = arith.maximumf %33, %34 : vector<8x256xf32>
    %36 = vector.extract_strided_slice %2 {offsets = [0, 11], sizes = [1, 256], strides = [1, 1]} : vector<1x384xf32> to vector<1x256xf32>
    %37 = vector.broadcast %36 : vector<1x256xf32> to vector<8x256xf32>
    %38 = arith.mulf %35, %37 : vector<8x256xf32>
    %39 = vector.extract_strided_slice %38 {offsets = [0, 0], sizes = [8, 128], strides = [1, 1]} : vector<8x256xf32> to vector<8x128xf32>
    %40 = vector.extract_strided_slice %38 {offsets = [0, 1], sizes = [8, 128], strides = [1, 1]} : vector<8x256xf32> to vector<8x128xf32>
    %41 = vector.extract_strided_slice %38 {offsets = [0, 2], sizes = [8, 128], strides = [1, 1]} : vector<8x256xf32> to vector<8x128xf32>
    %42 = vector.extract_strided_slice %38 {offsets = [0, 10], sizes = [8, 128], strides = [1, 1]} : vector<8x256xf32> to vector<8x128xf32>
    %43 = vector.extract_strided_slice %38 {offsets = [0, 11], sizes = [8, 128], strides = [1, 1]} : vector<8x256xf32> to vector<8x128xf32>
    %44 = vector.extract_strided_slice %38 {offsets = [0, 12], sizes = [8, 128], strides = [1, 1]} : vector<8x256xf32> to vector<8x128xf32>
    %45 = vector.extract_strided_slice %38 {offsets = [0, 20], sizes = [8, 128], strides = [1, 1]} : vector<8x256xf32> to vector<8x128xf32>
    %46 = vector.extract_strided_slice %38 {offsets = [0, 21], sizes = [8, 128], strides = [1, 1]} : vector<8x256xf32> to vector<8x128xf32>
    %47 = vector.extract_strided_slice %38 {offsets = [0, 22], sizes = [8, 128], strides = [1, 1]} : vector<8x256xf32> to vector<8x128xf32>
    %48 = tpu.concatenate %39, %40, %41, %42, %43, %44, %45, %46, %47 in 0 : vector<8x128xf32>, vector<8x128xf32>, vector<8x128xf32>, vector<8x128xf32>, vector<8x128xf32>, vector<8x128xf32>, vector<8x128xf32>, vector<8x128xf32>, vector<8x128xf32> -> vector<72x128xf32>
    %c0_19 = arith.constant 0 : index
    %c0_20 = arith.constant 0 : index
    %49 = vector.load %arg8[%c0_19, %c0_20] : memref<8x72xf32, #tpu.memory_space<vmem>>, vector<8x72xf32>
    %cst_21 = arith.constant dense<0.000000e+00> : vector<8x128xf32>
    %50 = tpu.matmul %49, %48, %cst_21 {dimension_numbers = #tpu.dot_dimension_numbers<[1], [0], [0], [1], [0, 0, 1, 1], [], []>} : vector<8x72xf32>, vector<72x128xf32>, vector<8x128xf32> -> vector<8x128xf32>
    %51 = arith.addf %50, %5 : vector<8x128xf32>
    %c0_22 = arith.constant 0 : index
    %c0_23 = arith.constant 0 : index
    %52 = vector.load %arg10[%c0_22, %c0_23] : memref<8x1xf32, #tpu.memory_space<vmem>>, vector<8x1xf32>
    %53 = vector.broadcast %52 : vector<8x1xf32> to vector<8x128xf32>
    %54 = arith.addf %51, %53 : vector<8x128xf32>
    %c0_24 = arith.constant 0 : index
    %c0_25 = arith.constant 0 : index
    %c0_26 = arith.constant 0 : index
    %55 = vector.load %arg11[%c0_24, %c0_25, %c0_26] : memref<1x8x128xf32, #tpu.memory_space<vmem>>, vector<1x8x128xf32>
    %56 = vector.shape_cast %55 : vector<1x8x128xf32> to vector<8x128xf32>
    %57 = vector.shape_cast %54 : vector<8x128xf32> to vector<1x8x128xf32>
    tpu.vector_store %arg11[%c0_24, %c0_25, %c0_26], %57 {strides = array<i32>} : memref<1x8x128xf32, #tpu.memory_space<vmem>>, vector<1x8x128xf32>,
    return
  }
  func.func @transform_0(%arg0: i32) -> (i32, i32, i32) {
    %c0_i32 = arith.constant 0 : i32
    %c0_i32_0 = arith.constant 0 : i32
    %c0_i32_1 = arith.constant 0 : i32
    return %arg0, %c0_i32, %c0_i32_0 : i32, i32, i32
  }
  func.func @transform_1(%arg0: i32) -> (i32, i32) {
    %c0_i32 = arith.constant 0 : i32
    %c0_i32_0 = arith.constant 0 : i32
    %c0_i32_1 = arith.constant 0 : i32
    return %c0_i32, %c0_i32_0 : i32, i32
  }
  func.func @transform_2(%arg0: i32) -> (i32, i32) {
    %c0_i32 = arith.constant 0 : i32
    %c0_i32_0 = arith.constant 0 : i32
    %c0_i32_1 = arith.constant 0 : i32
    return %c0_i32, %c0_i32_0 : i32, i32
  }
  func.func @transform_3(%arg0: i32) -> (i32, i32) {
    %c0_i32 = arith.constant 0 : i32
    %c0_i32_0 = arith.constant 0 : i32
    %c0_i32_1 = arith.constant 0 : i32
    return %c0_i32, %c0_i32_0 : i32, i32
  }
  func.func @transform_4(%arg0: i32) -> (i32, i32) {
    %c0_i32 = arith.constant 0 : i32
    %c0_i32_0 = arith.constant 0 : i32
    %c0_i32_1 = arith.constant 0 : i32
    return %c0_i32, %c0_i32_0 : i32, i32
  }
  func.func @transform_5(%arg0: i32) -> (i32, i32) {
    %c0_i32 = arith.constant 0 : i32
    %c0_i32_0 = arith.constant 0 : i32
    %c0_i32_1 = arith.constant 0 : i32
    return %c0_i32, %c0_i32_0 : i32, i32
  }
  func.func @transform_6(%arg0: i32) -> (i32, i32) {
    %c0_i32 = arith.constant 0 : i32
    %c0_i32_0 = arith.constant 0 : i32
    %c0_i32_1 = arith.constant 0 : i32
    return %c0_i32, %c0_i32_0 : i32, i32
  }
  func.func @transform_7(%arg0: i32) -> (i32, i32) {
    %c0_i32 = arith.constant 0 : i32
    %c0_i32_0 = arith.constant 0 : i32
    %c0_i32_1 = arith.constant 0 : i32
    return %c0_i32, %c0_i32_0 : i32, i32
  }
  func.func @transform_8(%arg0: i32) -> (i32, i32) {
    %c0_i32 = arith.constant 0 : i32
    %c0_i32_0 = arith.constant 0 : i32
    %c0_i32_1 = arith.constant 0 : i32
    return %c0_i32, %c0_i32_0 : i32, i32
  }
  func.func @transform_9(%arg0: i32) -> (i32, i32) {
    %c0_i32 = arith.constant 0 : i32
    %c0_i32_0 = arith.constant 0 : i32
    %c0_i32_1 = arith.constant 0 : i32
    return %c0_i32, %c0_i32_0 : i32, i32
  }
  func.func @transform_10(%arg0: i32) -> (i32, i32, i32) {
    %c0_i32 = arith.constant 0 : i32
    %c0_i32_0 = arith.constant 0 : i32
    %c0_i32_1 = arith.constant 0 : i32
    return %arg0, %c0_i32, %c0_i32_0 : i32, i32, i32
  }
}

</mosaic_0001>

<bundles_post_ra>
// kernel: down_forward.1
= control target key start
LH: loop header
LB: loop body
LE: loop exit
PB: predicated region body
PF: predicated region fallthrough
CT: control target
= control target key end

     0   :  { %s1113_s13 = smov 0   ;;  %s1226_s0 = inlined_call_operand.vmem [shape: f32[2,8,384], index: 0, kind: input, shape index: {}]   ;;  %s1227_s1 = inlined_call_operand.vmem [shape: f32[1,384], index: 1, kind: input, shape index: {}]   ;;  %s1228_s2 = inlined_call_operand.vmem [shape: f32[8,1], index: 2, kind: input, shape index: {}]   ;;  %s1229_s3 = inlined_call_operand.vmem [shape: f32[8,1], index: 3, kind: input, shape index: {}]   ;;  %s1230_s4 = inlined_call_operand.vmem [shape: f32[8,72], index: 4, kind: input, shape index: {}]   ;;  %s1231_s5 = inlined_call_operand.vmem [shape: f32[8,1], index: 5, kind: input, shape index: {}]   ;;  %s1232_s6 = inlined_call_operand.vmem [shape: f32[8,1], index: 6, kind: input, shape index: {}]   ;;  %s1233_s7 = inlined_call_operand.vmem [shape: f32[8,72], index: 7, kind: input, shape index: {}]   ;;  %s1234_s8 = inlined_call_operand.vmem [shape: f32[8,8], index: 8, kind: input, shape index: {}]   ;;  %s1235_s9 = inlined_call_operand.vmem [shape: f32[8,1], index: 9, kind: input, shape index: {}]   ;;  %s1236_s10 = inlined_call_operand.vmem [shape: f32[2,8,128], index: 10, kind: output, shape index: {}]  }
   0x1 LB: > { %s867_s14 = sadd.s32 4294967295, %s1044_s13   ;;  %p871_p0 = scmp.ge.s32.totalorder %s1044_s13, 1  ;;  %s1044_s13 = sphi %s1113_s13, %s20_s13  }
   0x2   : > { %p312_p1 = scmp.lt.s32.totalorder %s1044_s13, 3 }
   0x4   : > { %p313_p2 = pnand %p871_p0, %p312_p1 }
   0x5   : > { %v446_v0 = vld [vmem:[%s1228_s2] sm:$0xff] (!%p313_p2)  ;;  %v1046_v1 = vmov (!%p313_p2), 0   ;;  %p349_p3 = scmp.lt.s32.totalorder (!%p313_p2), %s867_s14, 1  ;;  %v468_v3 = vlaneseq (!%p313_p2)  ;;  %s1047_s25 = smov (!%p313_p2), 126   ;;  %v1053_v30 = vmov (!%p313_p2), 0.0   ;;  %vm495_vm0 = vcmask (!%p313_p2), 1039360  }
   0x6   : > { %316 = sbr.rel (%p313_p2) target bundleno = 875 (0x36b), region = 60  ;;  %966 = vset.pattern.permute.xlu0 (!%p313_p2), %v1046_v1  ;;  %1002 = vset.pattern.permute.xlu1 (!%p313_p2), %v1046_v1  ;;  %v455_v2 = vld [vmem:[%s1229_s3] sm:$0xff] (!%p313_p2)  ;;  %s1048_s26 = smov (!%p313_p2), 127   ;;  %vm506_vm1 = vcmask (!%p313_p2), 1031168   ;;  %vm517_vm2 = vcmask (!%p313_p2), 965632   ;;  %vm528_vm3 = vcmask (!%p313_p2), 957440  }
   0x7   : > { %449 = vperm.xlu0 (!%p313_p2), %966, %v446_v0   ;;  %v469_v4 = vshrl.u32 (!%p313_p2), %v468_v3, 7  ;;  %v361_v10 = vld [vmem:[%s1227_s1] sm:$0x7] (!%p313_p2)  ;;  %s1049_s27 = smov (!%p313_p2), 117   ;;  %s1050_s28 = smov (!%p313_p2), 118   ;;  %645 = vmatprep.mubr.f32.mxu1 (!%p313_p2), %v1053_v30  ;;  %vm539_vm4 = vcmask (!%p313_p2), 949248  }
   0x8   : > { %s1051_s29 = smov (!%p313_p2), 108   ;;  %s1052_s30 = smov (!%p313_p2), 116   ;;  %891 = vmatprep.subr.mxu0 (!%p313_p2), %v1053_v30  ;;  %v660_v31 = vld [vmem:[%s1232_s6] sm:$0xff] (!%p313_p2)  ;;  %vm550_vm5 = vcmask (!%p313_p2), 883712   ;;  %vm561_vm6 = vcmask (!%p313_p2), 875520   ;;  %vm369_vm7 = vcmask (!%p313_p2), 867328  }
   0x9   : > { %v474_v8 = vsub.s32 (!%p313_p2), 1, %v469_v4  ;;  %v478_v9 = vsub.s32 (!%p313_p2), 2, %v469_v4  ;;  %v470_v20 = vsub.s32 (!%p313_p2), 0, %v469_v4  ;;  %s1054_s11 = smov (!%p313_p2), 106   ;;  %s1055_s12 = smov (!%p313_p2), 107   ;;  %v652_v32 = vld [vmem:[%s1231_s5] sm:$0xff] (!%p313_p2) }
   0xa   : > { %vm577_vm8 = vcmask (!%p313_p2), 588800   ;;  %vm1056_vm9 = vmmov (!%p313_p2), 0   ;;  %vm372_vm10 = vcmask (!%p313_p2), 64512  }
   0xb   : > { %458 = vperm.xlu0 (!%p313_p2), %966, %v455_v2   ;;  %v475_v15 = vrot.slane (!%p313_p2), %v361_v10, %v474_v8  ;;  %v479_v19 = vrot.slane (!%p313_p2), %v361_v10, %v478_v9  ;;  %v471_v27 = vrot.slane (!%p313_p2), %v361_v10, %v470_v20  ;;  %893 = vmatprep.mubr.msk.f32.mxu0 (!%p313_p2), %vm1056_vm9, %v1053_v30 }
   0xd   : > { %s1238_s14 = smov (!%p349_p3, %s867_s14), 1 }
   0xe   : > { %s945_s19 = smul.u32 24, %s1238_s14 }
  0x10   : > { %s353_s22 = scalar_lea.vmem %s1226_s0, %s945_s19 }
  0x11   : > { %v359_v6 = vld [vmem:[%s353_s22 + $0x8] sm:$0xff]  ;;  %v360_v7 = vld [vmem:[%s353_s22 + $0x10] sm:$0xff]  ;;  %v358_v11 = vld [vmem:[%s353_s22] sm:$0xff] }
  0x86   : > { %v450_v5 = vpop.permute.xlu0 %449 }
  0x87   : > { %v453_v12 = vmul.f32 %v450_v5, %v359_v6  ;;  %v454_v13 = vmul.f32 %v450_v5, %v360_v7  ;;  %v452_v16 = vmul.f32 %v450_v5, %v358_v11 }
  0x8a   : > { %v459_v14 = vpop.permute.xlu0 %458 }
  0x8b   : > { %v462_v17 = vadd.f32 %v459_v14, %v453_v12  ;;  %v463_v18 = vadd.f32 %v459_v14, %v454_v13  ;;  %v461_v21 = vadd.f32 %v459_v14, %v452_v16 }
  0x8d   : > { %v465_v22 = vmax.f32 %v462_v17, 0.0  ;;  %v466_v23 = vmax.f32 %v463_v18, 0.0  ;;  %v464_v26 = vmax.f32 %v461_v21, 0.0 }
  0x8f   : > { %v484_v24 = vmul.f32 %v475_v15, %v465_v22  ;;  %v485_v25 = vmul.f32 %v479_v19, %v466_v23  ;;  %v483_v29 = vmul.f32 %v471_v27, %v464_v26  ;;  %v576_v23 = vld [vmem:[%s1230_s4] sm:$0xff] }
  0x91   : > { %v972_v28 = vpack.i.bf16 %v485_v25, %v484_v24 }
  0x93   : > { %973 = vrot.lane.b32.xlu0 %v972_v28, %s1047_s25  ;;  %968 = vrot.lane.b32.xlu1 %v972_v28, %s1048_s26 }
  0x97   : > { %500 = vrot.lane.b32.xlu0 %v483_v29, %s1047_s25  ;;  %489 = vrot.lane.b32.xlu1 %v483_v29, %s1048_s26 }
  0x9b   : > { %983 = vrot.lane.b32.xlu0 %v972_v28, %s1049_s27  ;;  %978 = vrot.lane.b32.xlu1 %v972_v28, %s1050_s28 }
  0x9f   : > { %522 = vrot.lane.b32.xlu0 %v483_v29, %s1049_s27  ;;  %511 = vrot.lane.b32.xlu1 %v483_v29, %s1050_s28 }
  0xa3   : > { %993 = vrot.lane.b32.xlu0 %v972_v28, %s1051_s29  ;;  %988 = vrot.lane.b32.xlu1 %v972_v28, %s1052_s30 }
  0xa7   : > { %544 = vrot.lane.b32.xlu0 %v483_v29, %s1051_s29  ;;  %533 = vrot.lane.b32.xlu1 %v483_v29, %s1052_s30 }
  0xab   : > { %568 = vrot.lane.b32.xlu0 %v484_v24, %s1054_s11  ;;  %998 = vrot.lane.b32.xlu1 %v972_v28, %s1055_s12 }
  0xaf   : > { %566 = vrot.lane.b32.xlu0 %v483_v29, %s1054_s11  ;;  %555 = vrot.lane.b32.xlu1 %v483_v29, %s1055_s12 }
  0xb3   : > { %663 = vperm.xlu0 %966, %v660_v31   ;;  %570 = vrot.lane.b32.xlu1 %v485_v25, %s1054_s11 }
  0xb7   : > { %655 = vperm.xlu1 %1002, %v652_v32   ;;  %672 = vrot.lane.b32.xlu0 %v475_v15, %s1049_s27 }
  0xbb   : > { %670 = vrot.lane.b32.xlu1 %v471_v27, %s1049_s27  ;;  %365 = vrot.lane.b32.xlu0 %v358_v11, %s1054_s11 }
  0xbf   : > { %674 = vrot.lane.b32.xlu1 %v479_v19, %s1049_s27 }
  0xc3   : > { %367 = vrot.lane.b32.xlu1 %v359_v6, %s1054_s11 }
 0x105   : > { %v974_v33 = vpop.permute.xlu0 %973  ;;  %v969_v34 = vpop.permute.xlu1 %968 }
 0x106   : > { %v971_v35 = vunpack.i.h.bf16 %v969_v34  ;;  %v970_v36 = vunpack.i.l.bf16 %v969_v34  ;;  %v976_v43 = vunpack.i.h.bf16 %v974_v33  ;;  %v975_v44 = vunpack.i.l.bf16 %v974_v33 }
 0x108   : > { %v497_v37 = vsel %vm495_vm0, %v970_v36, %v971_v35  ;;  %v508_v49 = vsel %vm506_vm1, %v975_v44, %v976_v43  ;;  %v1057_v43 = vmov 0.0|0.0  }
 0x109   : > { %v501_v38 = vpop.permute.xlu0 %500  ;;  %v490_v39 = vpop.permute.xlu1 %489  ;;  %v917_v40 = vpack.c.bf16 %v497_v37, %v484_v24 }
 0x10a   : > { %v496_v41 = vsel %vm495_vm0, %v490_v39, %v970_v36  ;;  %v507_v54 = vsel %vm506_vm1, %v501_v38, %v975_v44 }
 0x10b   : > { %918 = vmatprep.subr.bf16.mxu1 %v917_v40  ;;  %v919_v42 = vpack.c.bf16 %v496_v41, %v483_v29  ;;  %v362_v41 = vld [vmem:[%s1234_s8] sm:$0xff] }
 0x10d   : > { %v984_v45 = vpop.permute.xlu0 %983  ;;  %920 = vmatpush1.bf16.msra.mxu1 %v919_v42  ;;  %v979_v46 = vpop.permute.xlu1 %978 }
 0x10e   : > { %v981_v47 = vunpack.i.h.bf16 %v979_v46  ;;  %v980_v48 = vunpack.i.l.bf16 %v979_v46  ;;  %v986_v57 = vunpack.i.h.bf16 %v984_v45  ;;  %v985_v58 = vunpack.i.l.bf16 %v984_v45 }
 0x110   : > { %v519_v50 = vsel %vm517_vm2, %v980_v48, %v981_v47  ;;  %v530_v63 = vsel %vm528_vm3, %v985_v58, %v986_v57 }
 0x111   : > { %v523_v51 = vpop.permute.xlu0 %522  ;;  %v512_v52 = vpop.permute.xlu1 %511  ;;  %v921_v53 = vpack.c.bf16 %v519_v50, %v508_v49  ;;  %v806_v49 = vld [vmem:[%s1235_s9] sm:$0xff] }
 0x112   : > { %v518_v55 = vsel %vm517_vm2, %v512_v52, %v980_v48  ;;  %v529_v4 = vsel %vm528_vm3, %v523_v51, %v985_v58 }
 0x113   : > { %v923_v56 = vpack.c.bf16 %v518_v55, %v507_v54  ;;  %922 = vmatprep.subr.bf16.mxu1 %v921_v53 }
 0x115   : > { %v994_v59 = vpop.permute.xlu0 %993  ;;  %v989_v60 = vpop.permute.xlu1 %988  ;;  %924 = vmatpush1.bf16.msra.mxu1 %v923_v56 }
 0x116   : > { %v991_v61 = vunpack.i.h.bf16 %v989_v60  ;;  %v990_v62 = vunpack.i.l.bf16 %v989_v60  ;;  %v996_v7 = vunpack.i.h.bf16 %v994_v59  ;;  %v995_v8 = vunpack.i.l.bf16 %v994_v59 }
 0x118   : > { %v541_v0 = vsel %vm539_vm4, %v990_v62, %v991_v61  ;;  %v552_v13 = vsel %vm550_vm5, %v995_v8, %v996_v7 }
 0x119   : > { %v545_v1 = vpop.permute.xlu0 %544  ;;  %v534_v2 = vpop.permute.xlu1 %533  ;;  %v925_v3 = vpack.c.bf16 %v541_v0, %v530_v63 }
 0x11a   : > { %v540_v5 = vsel %vm539_vm4, %v534_v2, %v990_v62  ;;  %v551_v17 = vsel %vm550_vm5, %v545_v1, %v995_v8 }
 0x11b   : > { %v927_v6 = vpack.c.bf16 %v540_v5, %v529_v4  ;;  %926 = vmatprep.subr.bf16.mxu1 %v925_v3 }
 0x11d   : > { %v999_v9 = vpop.permute.xlu1 %998  ;;  %928 = vmatpush1.bf16.msra.mxu1 %v927_v6  ;;  %v569_v12 = vpop.permute.xlu0 %568 }
 0x11e   : > { %v1001_v10 = vunpack.i.h.bf16 %v999_v9  ;;  %v1000_v11 = vunpack.i.l.bf16 %v999_v9 }
 0x120   : > { %v563_v14 = vsel %vm561_vm6, %v1000_v11, %v1001_v10 }
 0x121   : > { %v556_v15 = vpop.permute.xlu1 %555  ;;  %v929_v16 = vpack.c.bf16 %v563_v14, %v552_v13  ;;  %v567_v20 = vpop.permute.xlu0 %566 }
 0x122   : > { %v562_v18 = vsel %vm561_vm6, %v556_v15, %v1000_v11  ;;  %v572_v24 = vsel %vm369_vm7, %v567_v20, %v569_v12  ;;  %v732_v20 = vld [vmem:[%s1233_s7] sm:$0xff] }
 0x123   : > { %v931_v19 = vpack.c.bf16 %v562_v18, %v551_v17  ;;  %930 = vmatprep.subr.bf16.mxu1 %v929_v16 }
 0x125   : > { %v571_v21 = vpop.permute.xlu1 %570  ;;  %932 = vmatpush1.bf16.msra.mxu1 %v931_v19 }
 0x126   : > { %v573_v22 = vsel %vm369_vm7, %v569_v12, %v571_v21 }
 0x127   : > { %597 = vmatprep.subr.mxu1 %v573_v22 }
 0x129   : > { %598 = vmatpush1.msra.mxu1 %v572_v24 }
 0x12a   : > { %875 = vmatmul.mubr.msk.f32.vlgmr.msra.gmra.mrb[0].mxu1 %vm577_vm8, %v576_v23 }
 0x132   : > { %v664_v26 = vpop.permute.xlu0 %663 }
 0x136   : > { %v656_v25 = vpop.permute.xlu1 %655  ;;  %v673_v27 = vpop.permute.xlu0 %672 }
 0x13a   : > { %v671_v28 = vpop.permute.xlu1 %670  ;;  %v366_v33 = vpop.permute.xlu0 %365 }
 0x13b   : > { %v676_v29 = vsel %vm528_vm3, %v671_v28, %v673_v27 }
 0x13e   : > { %v675_v31 = vpop.permute.xlu1 %674 }
 0x13f   : > { %v677_v32 = vsel %vm528_vm3, %v673_v27, %v675_v31 }
 0x142   : > { %v368_v34 = vpop.permute.xlu1 %367 }
 0x143   : > { %v370_v35 = vsel %vm369_vm7, %v366_v33, %v368_v34 }
 0x144   : > { %892 = vmatpush3.msra.mxu0 %v370_v35 }
 0x145   : > { %894 = vmatmul.mubr.msk.f32.vlgmr.msra.gmra.mrb[0].mxu0 %vm372_vm10, %v362_v41  ;;  %933 = vmatprep.subr.bf16.mxu0 %v1057_v43 }
 0x146   : > { %914 = vmatprep.mubr.msk.f32.mxu0 %vm1056_vm9, %v1053_v30 }
 0x1fd   : > { %v647_v36 = vpop.f32.mrb[0].mxu1 }
 0x1fe   : > { %v658_v37 = vmul.f32 %v656_v25, %v647_v36  ;;  %v649_v38 = vpop.f32.mrb[1].mxu1 }
 0x1ff   : > { %v659_v39 = vmul.f32 %v656_v25, %v649_v38 }
 0x200   : > { %v666_v40 = vadd.f32 %v664_v26, %v658_v37 }
 0x201   : > { %v667_v42 = vadd.f32 %v664_v26, %v659_v39 }
 0x202   : > { %v668_v44 = vmax.f32 %v666_v40, 0.0 }
 0x203   : > { %v669_v45 = vmax.f32 %v667_v42, 0.0 }
 0x204   : > { %v680_v46 = vmul.f32 %v676_v29, %v668_v44 }
 0x205   : > { %v681_v47 = vmul.f32 %v677_v32, %v669_v45 }
 0x207   : > { %v1008_v48 = vpack.i.bf16 %v681_v47, %v680_v46 }
 0x209   : > { %1009 = vrot.lane.b32.xlu1 %v1008_v48, %s1047_s25  ;;  %1004 = vrot.lane.b32.xlu0 %v1008_v48, %s1048_s26 }
 0x20d   : > { %1019 = vrot.lane.b32.xlu1 %v1008_v48, %s1049_s27  ;;  %1014 = vrot.lane.b32.xlu0 %v1008_v48, %s1050_s28  ;;  %s873_s27 = sshll.u32 %s1238_s14, 3 }
 0x211   : > { %1029 = vrot.lane.b32.xlu1 %v1008_v48, %s1051_s29  ;;  %1024 = vrot.lane.b32.xlu0 %v1008_v48, %s1052_s30  ;;  %s357_s30 = scalar_lea.vmem %s1236_s10, %s873_s27 }
 0x215   : > { %726 = vrot.lane.b32.xlu1 %v680_v46, %s1054_s11  ;;  %1034 = vrot.lane.b32.xlu0 %v1008_v48, %s1055_s12 }
 0x218   : > { %v442_v22 = vpop.f32.mrb[0].mxu0 }
 0x219   : > { %809 = vperm.xlu1 %1002, %v806_v49   ;;  %728 = vrot.lane.b32.xlu0 %v681_v47, %s1054_s11  ;;  %v895_v23 = vpop.f32.mrb[1].mxu0 }
 0x27b   : > { %v1010_v50 = vpop.permute.xlu1 %1009  ;;  %v1005_v51 = vpop.permute.xlu0 %1004 }
 0x27c   : > { %v1007_v52 = vunpack.i.h.bf16 %v1005_v51  ;;  %v1006_v53 = vunpack.i.l.bf16 %v1005_v51  ;;  %v1012_v54 = vunpack.i.h.bf16 %v1010_v50  ;;  %v1011_v55 = vunpack.i.l.bf16 %v1010_v50 }
 0x27e   : > { %v688_v56 = vsel %vm495_vm0, %v1006_v53, %v1007_v52  ;;  %v694_v62 = vsel %vm506_vm1, %v1011_v55, %v1012_v54 }
 0x27f   : > { %v934_v57 = vpack.c.bf16 %v688_v56, %v680_v46  ;;  %v1020_v58 = vpop.permute.xlu1 %1019  ;;  %v1015_v59 = vpop.permute.xlu0 %1014 }
 0x280   : > { %v1017_v60 = vunpack.i.h.bf16 %v1015_v59  ;;  %v1016_v61 = vunpack.i.l.bf16 %v1015_v59  ;;  %v1022_v63 = vunpack.i.h.bf16 %v1020_v58  ;;  %v1021_v0 = vunpack.i.l.bf16 %v1020_v58 }
 0x281   : > { %935 = vmatpush3.bf16.msra.mxu0 %v934_v57 }
 0x282   : > { %v700_v1 = vsel %vm517_vm2, %v1016_v61, %v1017_v60  ;;  %936 = vmatprep.subr.bf16.mxu0 %v1057_v43  ;;  %v706_v7 = vsel %vm528_vm3, %v1021_v0, %v1022_v63 }
 0x283   : > { %v937_v2 = vpack.c.bf16 %v700_v1, %v694_v62  ;;  %v1030_v3 = vpop.permute.xlu1 %1029  ;;  %v1025_v4 = vpop.permute.xlu0 %1024 }
 0x284   : > { %v1027_v5 = vunpack.i.h.bf16 %v1025_v4  ;;  %v1026_v6 = vunpack.i.l.bf16 %v1025_v4  ;;  %v1032_v8 = vunpack.i.h.bf16 %v1030_v3  ;;  %v1031_v9 = vunpack.i.l.bf16 %v1030_v3 }
 0x285   : > { %938 = vmatpush3.bf16.msra.mxu0 %v937_v2 }
 0x286   : > { %v712_v10 = vsel %vm539_vm4, %v1026_v6, %v1027_v5  ;;  %939 = vmatprep.subr.bf16.mxu0 %v1057_v43  ;;  %v718_v15 = vsel %vm550_vm5, %v1031_v9, %v1032_v8 }
 0x287   : > { %v940_v11 = vpack.c.bf16 %v712_v10, %v706_v7  ;;  %v1035_v12 = vpop.permute.xlu0 %1034  ;;  %v727_v19 = vpop.permute.xlu1 %726 }
 0x288   : > { %v1037_v13 = vunpack.i.h.bf16 %v1035_v12  ;;  %v1036_v14 = vunpack.i.l.bf16 %v1035_v12 }
 0x289   : > { %941 = vmatpush3.bf16.msra.mxu0 %v940_v11 }
 0x28a   : > { %v724_v16 = vsel %vm561_vm6, %v1036_v14, %v1037_v13  ;;  %942 = vmatprep.subr.bf16.mxu0 %v1057_v43 }
 0x28b   : > { %v943_v17 = vpack.c.bf16 %v724_v16, %v718_v15  ;;  %v729_v18 = vpop.permute.xlu0 %728 }
 0x28c   : > { %v730_v21 = vsel %vm369_vm7, %v727_v19, %v729_v18 }
 0x28d   : > { %944 = vmatpush3.bf16.msra.mxu0 %v943_v17 }
 0x28e   : > { %912 = vmatprep.subr.mxu0 %v1053_v30 }
 0x291   : > { %913 = vmatpush3.msra.mxu0 %v730_v21 }
 0x292   : > { %915 = vmatmul.mubr.msk.f32.vlgmr.msra.gmra.mrb[2].mxu0 %vm577_vm8, %v732_v20 }
 0x298   : > { %v810_v27 = vpop.permute.xlu1 %809 }
 0x365   : > { %v802_v24 = vpop.f32.mrb[2].mxu0 }
 0x366   : > { %v803_v25 = vadd.f32 %v802_v24, %v442_v22  ;;  %v916_v26 = vpop.f32.mrb[3].mxu0 }
 0x368   : > { %v812_v30 = vadd.f32 %v810_v27, %v803_v25 }
 0x36a   : > { %813 = vst [vmem:[%s357_s30] sm:$0xff] %v812_v30 }
 0x36b PF: > { %s20_s13 = sadd.s32 1, %s1044_s13  }
 0x36c   : > { %p17_p4 = scmp.ge.s32.totalorder %s20_s13, 4  }
 0x36e   :  { %19 = sbr.rel (!%p17_p4) target bundleno = 1 (0x1), region = 90 }

</bundles_post_ra>
